<compile_context>
chip_gen: v6e
topology: v6e:2x2x1
jax: 0.10.0
libtpu: 0.0.40
codegen_flags: <defaults>
</compile_context>

<pallas_src>
import numpy as np
import jax
import jax.numpy as jnp
from jax.experimental import pallas as pl
from jax.experimental.pallas import tpu as pltpu


# ----------------------------------------------------------------------------
# Init-time glue (NumPy): faithful port of rewiring_torch / PA_rewiring_torch
# ----------------------------------------------------------------------------
def _rewiring_np(weights, rng):
    # weights: 2-D array, modified in place (transposed views propagate like torch).
    st = np.zeros(weights.shape[1], dtype=np.float32)
    for neuron in range(1, weights.shape[0]):
        st = st + weights[neuron - 1]
        P = st + np.abs(np.min(st)) + 1.0
        # Normalize in float64 so rng.choice's sum-to-1 check passes.
        P = np.asarray(P, dtype=np.float64)
        P = P / P.sum()
        P = P / P.sum()
        targets = rng.choice(weights.shape[1], replace=False,
                             size=weights.shape[1], p=P)
        edges_to_rewire = np.argsort(weights[neuron])
        weights[neuron, targets] = weights[neuron, edges_to_rewire]
    return weights


def _pa_rewiring_np(weights, seed=0):
    rng = np.random.default_rng(seed)
    out_n = weights.shape[0]
    in_n = weights.size // out_n
    dims = weights.shape
    w = weights.reshape(out_n, in_n)
    _rewiring_np(w, rng)
    _rewiring_np(w.T, rng)   # transpose is a view -> in-place, same as torch
    return w.reshape(dims)


def _round_up(x, m):
    return ((x + m - 1) // m) * m


K_PAD = 896    # 784 padded up to 7*128
OUT_PAD = 128  # 10 padded up to one full lane group


def init_mlp_params(n_neurons, seed=0):
    """Deterministic init: normal(0, 0.05) weights (PyTorch (out,in) layout),
    zero biases, PA rewiring on layer1/layer2, then transpose to (in,out),
    lane-pad, and cast weights to bf16 for the kernel."""
    rng = np.random.default_rng(seed)
    w1 = rng.normal(0.0, 0.05, size=(n_neurons, 784)).astype(np.float32)
    w2 = rng.normal(0.0, 0.05, size=(n_neurons, n_neurons)).astype(np.float32)
    w3 = rng.normal(0.0, 0.05, size=(10, n_neurons)).astype(np.float32)
    b1 = np.zeros((1, n_neurons), np.float32)
    b2 = np.zeros((1, n_neurons), np.float32)
    b3 = np.zeros((1, OUT_PAD), np.float32)          # already lane-padded (zeros)

    w1 = _pa_rewiring_np(w1, seed=1)
    w2 = _pa_rewiring_np(w2, seed=2)

    # Transpose to (in, out) for the kernel's x @ W convention, pad, cast bf16.
    w1_t = np.zeros((K_PAD, n_neurons), np.float32)
    w1_t[:784, :] = w1.T
    w3_t = np.zeros((n_neurons, OUT_PAD), np.float32)
    w3_t[:, :10] = w3.T

    return dict(
        w1=jnp.asarray(w1_t, dtype=jnp.bfloat16), b1=jnp.asarray(b1),
        w2=jnp.asarray(w2.T, dtype=jnp.bfloat16), b2=jnp.asarray(b2),
        w3=jnp.asarray(w3_t, dtype=jnp.bfloat16), b3=jnp.asarray(b3),
    )


# ----------------------------------------------------------------------------
# Pallas kernel: fused 3-layer MLP forward (bf16 matmuls on MXU, f32 accumulate)
# ----------------------------------------------------------------------------
def mlp_kernel(x_ref, w1_ref, b1_ref, w2_ref, b2_ref, w3_ref, b3_ref, o_ref):
    x = x_ref[...]                                                  # (TB, 896) bf16
    h1 = jnp.dot(x, w1_ref[...], preferred_element_type=jnp.float32) + b1_ref[...]
    h1 = jnp.maximum(h1, 0.0).astype(jnp.bfloat16)                  # ReLU
    h2 = jnp.dot(h1, w2_ref[...], preferred_element_type=jnp.float32) + b2_ref[...]
    h2 = jnp.maximum(h2, 0.0).astype(jnp.bfloat16)
    out = jnp.dot(h2, w3_ref[...], preferred_element_type=jnp.float32) + b3_ref[...]
    o_ref[...] = out.astype(o_ref.dtype)                            # (TB, 128) lane-dense


def mlp_forward(x, params, tb=None):
    """x: (B, 784) f32/bf16. Returns (B, 10) f32 logits."""
    B = x.shape[0]
    H = params["w2"].shape[0]

    # Batch tile: sublane-aligned, capped; pad B to a whole number of tiles.
    if tb is None:
        tb = min(256, _round_up(B, 8))
    tb = max(8, _round_up(tb, 8))
    b_pad = _round_up(B, tb)
    grid = (b_pad // tb,)

    # Zero-pad batch rows + K columns (784 -> 896) and cast to bf16 (halves DMA).
    xp = jnp.zeros((b_pad, K_PAD), jnp.bfloat16)
    xp = xp.at[:B, :x.shape[1]].set(x.astype(jnp.bfloat16))

    def batch_map(i):
        return (i, 0)

    def const_map(i):
        return (0, 0)

    in_specs = [
        pl.BlockSpec((tb, K_PAD), batch_map),          # x tile
        pl.BlockSpec((K_PAD, H), const_map),           # w1 (resident)
        pl.BlockSpec((1, H), const_map),               # b1
        pl.BlockSpec((H, H), const_map),               # w2
        pl.BlockSpec((1, H), const_map),               # b2
        pl.BlockSpec((H, OUT_PAD), const_map),         # w3
        pl.BlockSpec((1, OUT_PAD), const_map),         # b3
    ]
    out_spec = pl.BlockSpec((tb, OUT_PAD), batch_map)

    # Deliberate VMEM budget (v5e default is only 16 MiB; cap within v7x physical).
    block_bytes = (
        2 * tb * K_PAD * 2 +                # x (double-buffered)
        K_PAD * H * 2 + H * 4 +             # w1, b1 (resident)
        H * H * 2 + H * 4 +                 # w2, b2
        H * OUT_PAD * 2 + OUT_PAD * 4 +     # w3, b3
        2 * tb * OUT_PAD * 4                # out (double-buffered)
    )
    vmem_limit = min(64 << 20, max(32 << 20, 4 * block_bytes))

    out = pl.pallas_call(
        mlp_kernel,
        out_shape=jax.ShapeDtypeStruct((b_pad, OUT_PAD), jnp.float32),
        grid=grid,
        in_specs=in_specs,
        out_specs=out_spec,
        compiler_params=pltpu.CompilerParams(
            dimension_semantics=("parallel",),
            vmem_limit_bytes=vmem_limit,
        ),
    )(xp, params["w1"], params["b1"], params["w2"], params["b2"],
      params["w3"], params["b3"])

    return out[:B, :10]


# ----------------------------------------------------------------------------
def ref_forward(x, params):
    """Plain-JAX reference using the exact same padded bf16 params."""
    xp = jnp.zeros((x.shape[0], K_PAD), jnp.bfloat16)
    xp = xp.at[:, :x.shape[1]].set(x.astype(jnp.bfloat16))
    h1 = jnp.dot(xp, params["w1"], preferred_element_type=jnp.float32) + params["b1"]
    h1 = jnp.maximum(h1, 0.0).astype(jnp.bfloat16)
    h2 = jnp.dot(h1, params["w2"], preferred_element_type=jnp.float32) + params["b2"]
    h2 = jnp.maximum(h2, 0.0).astype(jnp.bfloat16)
    out = jnp.dot(h2, params["w3"], preferred_element_type=jnp.float32) + params["b3"]
    return out[:, :10]


if __name__ == "__main__":
    N_NEURONS = 128   # hidden width (lane-dense multiple of 128)
    BATCH = 32        # small example batch; exercises grid=(2,) with tb=16

    params = init_mlp_params(N_NEURONS, seed=0)

    key = jax.random.PRNGKey(0)
    x = jax.random.normal(key, (BATCH, 784), dtype=jnp.float32)

    out = mlp_forward(x, params, tb=16)
    out = jax.block_until_ready(out)
    assert out.shape == (BATCH, 10)

    ref = jax.block_until_ready(ref_forward(x, params))
    np.testing.assert_allclose(np.asarray(out), np.asarray(ref),
                               rtol=1e-3, atol=1e-3)
    print("KERNEL_OK")
</pallas_src>

<mosaic_0001>
module attributes {stable_mosaic.version = 11 : i64} {
  func.func @mlp_kernel(%arg0: i32, %arg1: memref<16x896xbf16, #tpu.memory_space<vmem>>, %arg2: memref<896x128xbf16, #tpu.memory_space<vmem>>, %arg3: memref<1x128xf32, #tpu.memory_space<vmem>>, %arg4: memref<128x128xbf16, #tpu.memory_space<vmem>>, %arg5: memref<1x128xf32, #tpu.memory_space<vmem>>, %arg6: memref<128x128xbf16, #tpu.memory_space<vmem>>, %arg7: memref<1x128xf32, #tpu.memory_space<vmem>>, %arg8: memref<16x128xf32, #tpu.memory_space<vmem>>) attributes {dimension_semantics = [#tpu.dimension_semantics<parallel>], iteration_bounds = array<i64: 2>, scalar_prefetch = 0 : i64, scratch_operands = 0 : i64, tpu.core_type = #tpu.core_type<tc>, window_params = [{transform_indices = @transform_0, window_bounds = array<i64: 16, 896>}, {pipeline_mode = #tpu.pipeline_mode<synchronous>, transform_indices = @transform_1, window_bounds = array<i64: 896, 128>}, {pipeline_mode = #tpu.pipeline_mode<synchronous>, transform_indices = @transform_2, window_bounds = array<i64: 1, 128>}, {pipeline_mode = #tpu.pipeline_mode<synchronous>, transform_indices = @transform_3, window_bounds = array<i64: 128, 128>}, {pipeline_mode = #tpu.pipeline_mode<synchronous>, transform_indices = @transform_4, window_bounds = array<i64: 1, 128>}, {pipeline_mode = #tpu.pipeline_mode<synchronous>, transform_indices = @transform_5, window_bounds = array<i64: 128, 128>}, {pipeline_mode = #tpu.pipeline_mode<synchronous>, transform_indices = @transform_6, window_bounds = array<i64: 1, 128>}, {transform_indices = @transform_7, window_bounds = array<i64: 16, 128>}]} {
    %c0 = arith.constant 0 : index
    %c0_0 = arith.constant 0 : index
    %0 = vector.load %arg1[%c0, %c0_0] : memref<16x896xbf16, #tpu.memory_space<vmem>>, vector<16x896xbf16>
    %c0_1 = arith.constant 0 : index
    %c0_2 = arith.constant 0 : index
    %1 = vector.load %arg2[%c0_1, %c0_2] : memref<896x128xbf16, #tpu.memory_space<vmem>>, vector<896x128xbf16>
    %cst = arith.constant dense<0.000000e+00> : vector<16x128xf32>
    %2 = tpu.matmul %0, %1, %cst {dimension_numbers = #tpu.dot_dimension_numbers<[1], [0], [0], [1], [0, 0, 1, 1], [], []>} : vector<16x896xbf16>, vector<896x128xbf16>, vector<16x128xf32> -> vector<16x128xf32>
    %c0_3 = arith.constant 0 : index
    %c0_4 = arith.constant 0 : index
    %3 = vector.load %arg3[%c0_3, %c0_4] : memref<1x128xf32, #tpu.memory_space<vmem>>, vector<1x128xf32>
    %4 = vector.broadcast %3 : vector<1x128xf32> to vector<16x128xf32>
    %5 = arith.addf %2, %4 : vector<16x128xf32>
    %cst_5 = arith.constant 0.000000e+00 : f32
    %6 = vector.broadcast %cst_5 : f32 to vector<16x128xf32>
    %7 = arith.maximumf %5, %6 : vector<16x128xf32>
    %8 = arith.truncf %7 : vector<16x128xf32> to vector<16x128xbf16>
    %c0_6 = arith.constant 0 : index
    %c0_7 = arith.constant 0 : index
    %9 = vector.load %arg4[%c0_6, %c0_7] : memref<128x128xbf16, #tpu.memory_space<vmem>>, vector<128x128xbf16>
    %cst_8 = arith.constant dense<0.000000e+00> : vector<16x128xf32>
    %10 = tpu.matmul %8, %9, %cst_8 {dimension_numbers = #tpu.dot_dimension_numbers<[1], [0], [0], [1], [0, 0, 1, 1], [], []>} : vector<16x128xbf16>, vector<128x128xbf16>, vector<16x128xf32> -> vector<16x128xf32>
    %c0_9 = arith.constant 0 : index
    %c0_10 = arith.constant 0 : index
    %11 = vector.load %arg5[%c0_9, %c0_10] : memref<1x128xf32, #tpu.memory_space<vmem>>, vector<1x128xf32>
    %12 = vector.broadcast %11 : vector<1x128xf32> to vector<16x128xf32>
    %13 = arith.addf %10, %12 : vector<16x128xf32>
    %cst_11 = arith.constant 0.000000e+00 : f32
    %14 = vector.broadcast %cst_11 : f32 to vector<16x128xf32>
    %15 = arith.maximumf %13, %14 : vector<16x128xf32>
    %16 = arith.truncf %15 : vector<16x128xf32> to vector<16x128xbf16>
    %c0_12 = arith.constant 0 : index
    %c0_13 = arith.constant 0 : index
    %17 = vector.load %arg6[%c0_12, %c0_13] : memref<128x128xbf16, #tpu.memory_space<vmem>>, vector<128x128xbf16>
    %cst_14 = arith.constant dense<0.000000e+00> : vector<16x128xf32>
    %18 = tpu.matmul %16, %17, %cst_14 {dimension_numbers = #tpu.dot_dimension_numbers<[1], [0], [0], [1], [0, 0, 1, 1], [], []>} : vector<16x128xbf16>, vector<128x128xbf16>, vector<16x128xf32> -> vector<16x128xf32>
    %c0_15 = arith.constant 0 : index
    %c0_16 = arith.constant 0 : index
    %19 = vector.load %arg7[%c0_15, %c0_16] : memref<1x128xf32, #tpu.memory_space<vmem>>, vector<1x128xf32>
    %20 = vector.broadcast %19 : vector<1x128xf32> to vector<16x128xf32>
    %21 = arith.addf %18, %20 : vector<16x128xf32>
    %c0_17 = arith.constant 0 : index
    %c0_18 = arith.constant 0 : index
    %22 = vector.load %arg8[%c0_17, %c0_18] : memref<16x128xf32, #tpu.memory_space<vmem>>, vector<16x128xf32>
    tpu.vector_store %arg8[%c0_17, %c0_18], %21 {strides = array<i32>} : memref<16x128xf32, #tpu.memory_space<vmem>>, vector<16x128xf32>,
    return
  }
  func.func @transform_0(%arg0: i32) -> (i32, i32) {
    %c0_i32 = arith.constant 0 : i32
    %c0_i32_0 = arith.constant 0 : i32
    return %arg0, %c0_i32 : i32, i32
  }
  func.func @transform_1(%arg0: i32) -> (i32, i32) {
    %c0_i32 = arith.constant 0 : i32
    %c0_i32_0 = arith.constant 0 : i32
    %c0_i32_1 = arith.constant 0 : i32
    return %c0_i32, %c0_i32_0 : i32, i32
  }
  func.func @transform_2(%arg0: i32) -> (i32, i32) {
    %c0_i32 = arith.constant 0 : i32
    %c0_i32_0 = arith.constant 0 : i32
    %c0_i32_1 = arith.constant 0 : i32
    return %c0_i32, %c0_i32_0 : i32, i32
  }
  func.func @transform_3(%arg0: i32) -> (i32, i32) {
    %c0_i32 = arith.constant 0 : i32
    %c0_i32_0 = arith.constant 0 : i32
    %c0_i32_1 = arith.constant 0 : i32
    return %c0_i32, %c0_i32_0 : i32, i32
  }
  func.func @transform_4(%arg0: i32) -> (i32, i32) {
    %c0_i32 = arith.constant 0 : i32
    %c0_i32_0 = arith.constant 0 : i32
    %c0_i32_1 = arith.constant 0 : i32
    return %c0_i32, %c0_i32_0 : i32, i32
  }
  func.func @transform_5(%arg0: i32) -> (i32, i32) {
    %c0_i32 = arith.constant 0 : i32
    %c0_i32_0 = arith.constant 0 : i32
    %c0_i32_1 = arith.constant 0 : i32
    return %c0_i32, %c0_i32_0 : i32, i32
  }
  func.func @transform_6(%arg0: i32) -> (i32, i32) {
    %c0_i32 = arith.constant 0 : i32
    %c0_i32_0 = arith.constant 0 : i32
    %c0_i32_1 = arith.constant 0 : i32
    return %c0_i32, %c0_i32_0 : i32, i32
  }
  func.func @transform_7(%arg0: i32) -> (i32, i32) {
    %c0_i32 = arith.constant 0 : i32
    %c0_i32_0 = arith.constant 0 : i32
    return %arg0, %c0_i32 : i32, i32
  }
}

</mosaic_0001>

<bundles_post_ra>
// kernel: tpu_custom_call.1
= control target key start
LH: loop header
LB: loop body
LE: loop exit
PB: predicated region body
PF: predicated region fallthrough
CT: control target
= control target key end

     0   :  { %s2263_s0 = inlined_call_operand.hbm [shape: bf16[32,896], index: 0, kind: input, shape index: {}]   ;;  %s2264_s1 = inlined_call_operand.hbm [shape: bf16[896,128], index: 1, kind: input, shape index: {}]   ;;  %s2265_s2 = inlined_call_operand.vmem [shape: f32[1,128], index: 2, kind: input, shape index: {}]   ;;  %s2266_s3 = inlined_call_operand.hbm [shape: bf16[128,128], index: 3, kind: input, shape index: {}]   ;;  %s2267_s4 = inlined_call_operand.vmem [shape: f32[1,128], index: 4, kind: input, shape index: {}]   ;;  %s2268_s5 = inlined_call_operand.hbm [shape: bf16[128,128], index: 5, kind: input, shape index: {}]   ;;  %s2269_s6 = inlined_call_operand.vmem [shape: f32[1,128], index: 6, kind: input, shape index: {}]   ;;  %s2270_s7 = inlined_call_operand.hbm [shape: f32[32,128], index: 7, kind: output, shape index: {}]  }
   0x1   :  { %2275 = sst [smem:[#allocation15_spill]] %s2264_s1 }
   0x2   :  { %12 = vsyncpa [#allocation3], 0 }
   0x3   :  { %14 = vsyncpa [#allocation3 + $0x1], 0 }
   0x4   :  { %15 = vsyncpa [#allocation6], 0 }
   0x5   :  { %16 = vsyncpa [#allocation9], 0 }
   0x6   :  { %17 = vsyncpa [#allocation4], 0 }
   0x7   :  { %19 = vsyncpa [#allocation4 + $0x1], 0  ;;  %s2014_s24 = smov 0   ;;  %s2016_s25 = smov 0  }
   0x8   :  { %s2018_s26 = smov 0   ;;  %s2020_s27 = smov 0  }
   0x9 LB: > { %s2035_s28 = sadd.s32 4294967295, %s1959_s27   ;;  %s1356_s29 = sadd.s32 4294967294, %s1959_s27   ;;  %s1959_s27 = sphi %s2020_s27, %s2296_s27   ;;  %s1955_s26 = sphi %s2018_s26, %s2295_s26   ;;  %s1951_s25 = sphi %s2016_s25, %s2294_s25   ;;  %s1947_s24 = sphi %s2014_s24, %s2293_s24  }
   0xa   : > { %p45_p0 = scmp.ne.s32.totalorder %s1951_s25, %s1947_s24  ;;  %p2271_p1 = scmp.eq.s32.totalorder %s2035_s28, 0 }
   0xb   : > { %p201_p3 = scmp.eq.s32.totalorder %s1356_s29, 1  ;;  %p1357_p5 = scmp.ge.s32.totalorder %s1959_s27, 1 }
   0xc   : > { %p2044_p4 = por %p2271_p1, %p45_p0  ;;  %p208_p7 = scmp.lt.s32.totalorder %s1959_s27, 3 }
   0xd   : > { %p2049_p6 = por %p201_p3, %p45_p0  ;;  %s1961_s10 = smov [#allocation5]  }
   0xe   : > { %s2276_s30 = scalar_select %p2044_p4, 1, 0 }
   0xf   : > { %s2277_s8 = scalar_select %p2049_p6, 1, 0 }
  0x10   : > { %p2054_p8 = pnand %p1357_p5, %p208_p7  ;;  %s220_s11 = sshll.u32 %s1961_s10, 4  ;;  %s221_s11 = int_to_ptr.vmem [resolvable:$true] %s220_s11 }
  0x11   : > { %s1962_s13 = smov [#allocation7]   ;;  %s1963_s15 = smov [#allocation8]  }
  0x12   : > { %s2278_s9 = scalar_select %p2054_p8, 1, 0 }
  0x13   : > { %p1630_p9 = pneg %p2054_p8  ;;  %s236_s14 = sshll.u32 %s1962_s13, 4  ;;  %s237_s14 = int_to_ptr.vmem [resolvable:$true] %s236_s14 }
  0x14   : > { %s252_s16 = sshll.u32 %s1963_s15, 4  ;;  %s1792_s17 = scalar_lea.vmem %s221_s11, 7168  ;;  %s253_s16 = int_to_ptr.vmem [resolvable:$true] %s252_s16 }
  0x15   : > { %p2063_p11 = pnand %p1630_p9, %p2271_p1  ;;  %p1793_p13 = scmp.ne.s32.totalorder %s221_s11, %s1792_s17 }
  0x16   : > { %p1800_p5 = scmp.lt.s32.totalorder %s221_s11, %s221_s11  ;;  %p1801_p7 = scmp.lt.s32.totalorder %s1792_s17, %s1792_s17 }
  0x17   : > { %p1783_p12 = pneg %p2063_p11 }
  0x18   : > { %p1802_p9 = por %p1801_p7, %p1800_p5 }
  0x19   : > { %p1795_p0 = pnand %p1793_p13, %p1783_p12 }
  0x1b   : > { %p1796_p3 = pneg %p1795_p0 }
  0x1d   : > { %p1803_p10 = pnand %p1802_p9, %p1796_p3 }
  0x1f   : > { %1806 = shalt.err (!%p1803_p10)
}
  0x20   : > { %s1964_s18 = smov 64   ;;  %s1965_s19 = smov 4  }
  0x21   : > { %s2280_s1 = sld [smem:[#allocation15_spill]]  ;;  %s1818_s22 = scalar_lea.vmem %s237_s14, 1024 }
  0x22   : > { %p1819_p1 = scmp.ne.s32.totalorder %s237_s14, %s1818_s22  ;;  %p1826_p2 = scmp.lt.s32.totalorder %s237_s14, %s237_s14 }
  0x23   : > { %p1827_p6 = scmp.lt.s32.totalorder %s1818_s22, %s1818_s22 }
  0x24   : > { %p1821_p13 = pnand %p1819_p1, %p1783_p12 }
  0x25   : > { %p1828_p5 = por %p1827_p6, %p1826_p2 }
  0x26   : > { %p1822_p0 = pneg %p1821_p13 }
  0x27   : > { %1633 = dma.hbm_to_vmem [thread:$0]  (!%p2063_p11), %s2280_s1, 7168, %s221_s11, [#allocation6], %s1964_s18, %s1964_s18, %s1965_s19  }
  0x28   : > { %p1829_p3 = pnand %p1828_p5, %p1822_p0 }
  0x2a   : > { %1832 = shalt.err (!%p1829_p3)
}
  0x2b   : > { %1636 = dma.hbm_to_vmem [thread:$0]  (!%p2063_p11), %s2266_s3, 1024, %s237_s14, [#allocation6], %s1964_s18, %s1964_s18, %s1965_s19  }
  0x2c   : > { %s1844_s10 = scalar_lea.vmem %s253_s16, 1024  ;;  %p1852_p9 = scmp.lt.s32.totalorder %s253_s16, %s253_s16 }
  0x2d   : > { %p1845_p10 = scmp.ne.s32.totalorder %s253_s16, %s1844_s10  ;;  %p1853_p13 = scmp.lt.s32.totalorder %s1844_s10, %s1844_s10 }
  0x2f   : > { %p1847_p7 = pnand %p1845_p10, %p1783_p12  ;;  %p1854_p4 = por %p1853_p13, %p1852_p9 }
  0x31   : > { %p1848_p1 = pneg %p1847_p7 }
  0x33   : > { %p1855_p2 = pnand %p1854_p4, %p1848_p1 }
  0x35   : > { %1858 = shalt.err (!%p1855_p2)
}
  0x36   : > { %1639 = dma.hbm_to_vmem [thread:$0]  (!%p2063_p11), %s2268_s5, 1024, %s253_s16, [#allocation9], %s1964_s18, %s1964_s18, %s1965_s19  }
  0x37   : > { %s2094_s14 = sadd.s32 1, %s1959_s27   ;;  %s32_s12 = sadd.s32 1, %s1955_s26 }
  0x38   : > { %s29_s15 = ssub.s32 %s1959_s27, %s2094_s14  ;;  %p39_p6 = scmp.ne.s32.totalorder %s1955_s26, %s1951_s25 }
  0x39   : > { %p30_p4 = scmp.eq.s32.totalorder %s29_s15, 0  ;;  %p40_p12 = scmp.eq.s32.totalorder %s1959_s27, 0 }
  0x3a   : > { %p1651_p0 = scmp.lt.s32.totalorder %s1959_s27, 2  ;;  %p2281_p3 = scmp.eq.s32.totalorder %s2035_s28, 1 }
  0x3b   : > { %s2104_s17 = scalar_select %p30_p4, %s1955_s26, %s32_s12  }
  0x3c   : > { %p41_p5 = por %p40_p12, %p39_p6  ;;  %p2108_p10 = por %p2281_p3, %p39_p6 }
  0x3d   : > { %s269_s21 = sand.u32 1, %s1955_s26   ;;  %s1612_s22 = smul.u32 896, %s1959_s27 }
  0x3e   : > { %s2282_s20 = scalar_select %p2108_p10, 1, 0 }
  0x3f   : > { %s1611_s16 = smul.u32 56, %s269_s21  ;;  %s2117_s23 = scalar_lea.hbm %s2263_s0, %s1612_s22 }
  0x40   : > { %p2119_p11 = pnand %p1651_p0, %p41_p5  ;;  %s2125_s13 = scalar_lea.sflag [#allocation3], %s269_s21 }
  0x41   : > { %s273_s10 = scalar_lea.vmem [#allocation2], %s1611_s16  ;;  %s1859_s15 = scalar_lea.hbm %s2117_s23, 896 }
  0x42   : > { %s281_s11 = sshll.u32 %s273_s10, 4  ;;  %p1860_p7 = scmp.ne.s32.totalorder %s2117_s23, %s1859_s15  ;;  %s2123_s11 = int_to_ptr.vmem [resolvable:$true] %s281_s11 }
  0x43   : > { %p1861_p1 = pneg %p2119_p11  ;;  %s1864_s18 = scalar_lea.hbm %s2263_s0, 1792 }
  0x44   : > { %p1865_p2 = scmp.lt.s32.totalorder %s2117_s23, %s2263_s0  ;;  %p1866_p4 = scmp.lt.s32.totalorder %s1864_s18, %s1859_s15 }
  0x45   : > { %p1862_p9 = pnand %p1861_p1, %p1860_p7 }
  0x46   : > { %p1867_p6 = por %p1866_p4, %p1865_p2 }
  0x47   : > { %p1863_p13 = pneg %p1862_p9 }
  0x49   : > { %p1868_p12 = pnand %p1867_p6, %p1863_p13 }
  0x4b   : > { %1871 = shalt.err (!%p1868_p12)
}
  0x4c   : > { %s1872_s21 = scalar_lea.vmem %s2123_s11, 896  ;;  %s1966_s16 = smov [#allocation2]  }
  0x4d   : > { %p1873_p0 = scmp.ne.s32.totalorder %s2123_s11, %s1872_s21  ;;  %s1877_s10 = sshll.u32 %s1966_s16, 4  ;;  %s1878_s10 = int_to_ptr.vmem [resolvable:$false] %s1877_s10 }
  0x4e   : > { %s1879_s12 = scalar_lea.vmem %s1878_s10, 1792  ;;  %p1880_p7 = scmp.lt.s32.totalorder %s2123_s11, %s1878_s10 }
  0x4f   : > { %p1875_p5 = pnand %p1873_p0, %p1861_p1  ;;  %p1881_p9 = scmp.lt.s32.totalorder %s1879_s12, %s1872_s21 }
  0x51   : > { %p1876_p3 = pneg %p1875_p5  ;;  %p1882_p10 = por %p1881_p9, %p1880_p7 }
  0x53   : > { %p1883_p8 = pnand %p1882_p10, %p1876_p3 }
  0x55   : > { %1886 = shalt.err (!%p1883_p8)
}
  0x56   : > { %s1967_s1 = smov 448   ;;  %s1968_s15 = smov 28  }
  0x57   : > { %1643 = dma.hbm_to_vmem [thread:$0]  (!%p2119_p11), %s2117_s23, 896, %s2123_s11, %s2125_s13, %s1967_s1, %s1967_s1, %s1968_s15  }
  0x58   : > { %p2284_p1 = scmp.ne.s32.totalorder %s2278_s9, 0 }
  0x59   : > { %s2149_s22 = sand.u32 (!%p2284_p1), 1, %s1951_s25   ;;  %p2285_p8 = scmp.ne.s32.totalorder (!%p2284_p1), %s2276_s30, 0 }
  0x5a   : > { %293 = sbr.rel (%p2284_p1) target bundleno = 793 (0x319), region = 48  ;;  %s296_s19 = scalar_lea.sflag (!%p2284_p1), [#allocation3], %s2149_s22 }
  0x5b   : > { %s1613_s18 = smul.u32 (!%p2284_p1), 56, %s2149_s22 }
  0x5d   : > { %s2153_s21 = scalar_lea.vmem (!%p2284_p1), [#allocation2], %s1613_s18 }
  0x5f   : > { %1930 = dma.done.wait (%p2285_p8), %s296_s19, 896  }
  0x60   : > { %1932 = vsyncadd (%p2285_p8), %s296_s19, 4294966400  ;;  %p2286_p10 = scmp.eq.s32.totalorder %s2035_s28, 0 }
  0x62   : > { %1934 = dma.done.wait (%p2286_p10), [#allocation6], 8192   ;;  %p2287_p11 = pmov %p2286_p10 }
  0x63   : > { %p2288_p13 = pmov %p2286_p10 }
  0x64   : > { %1936 = vsyncadd (%p2287_p11), [#allocation6], 4294959104 }
  0x65   : > { %1938 = dma.done.wait (%p2288_p13), [#allocation9], 1024   ;;  %p2289_p2 = pmov %p2286_p10 }
  0x66   : > { %v1699_v0 = vld [vmem:[#allocation5 + $0x78] sm:$0xff]   ;;  %v1703_v4 = vld [vmem:[#allocation5 + $0x70] sm:$0xff]   ;;  %v1707_v8 = vld [vmem:[#allocation5 + $0x68] sm:$0xff]   ;;  %v1969_v36 = vmov 0.0   ;;  %vm1970_vm0 = vmmov 0   ;;  %s1369_s11 = sshll.u32 %s2149_s22, 4 }
  0x67   : > { %1940 = vsyncadd (%p2289_p2), [#allocation9], 4294966272  ;;  %v1700_v1 = vld [vmem:[#allocation5 + $0xf8] sm:$0xff]   ;;  %1458 = vmatprep.subr.bf16.mxu0 %v1699_v0  ;;  %v1704_v5 = vld [vmem:[#allocation5 + $0xf0] sm:$0xff]   ;;  %s341_s10 = scalar_lea.vmem [#allocation10], %s1369_s11  ;;  %s1457_s1 = sshll.u32 %s2035_s28, 8 }
  0x68   : > { %v1701_v2 = vld [vmem:[#allocation5 + $0x38] sm:$0xff]   ;;  %1480 = vmatprep.subr.bf16.mxu1 %v1700_v1  ;;  %v1705_v6 = vld [vmem:[#allocation5 + $0x30] sm:$0xff]   ;;  %v1708_v9 = vld [vmem:[#allocation5 + $0xe8] sm:$0xff]   ;;  %s1254_s12 = sshll.u32 %s341_s10, 4  ;;  %s2220_s19 = scalar_lea.hbm %s2270_s7, %s1457_s1  ;;  %s2215_s12 = int_to_ptr.vmem [resolvable:$true] %s1254_s12 }
  0x69   : > { %v1702_v3 = vld [vmem:[#allocation5 + $0xb8] sm:$0xff]   ;;  %1459 = vmatpush3.bf16.msra.mxu0 %v1701_v2  ;;  %v1706_v7 = vld [vmem:[#allocation5 + $0xb0] sm:$0xff]   ;;  %v1709_v10 = vld [vmem:[#allocation5 + $0x28] sm:$0xff]   ;;  %s1887_s30 = scalar_lea.vmem %s2215_s12, 256  ;;  %p2290_p6 = scmp.ne.s32.totalorder %s2282_s20, 0 }
  0x6a   : > { %1481 = vmatpush3.bf16.msra.mxu1 %v1702_v3  ;;  %1460 = vmatprep.subr.bf16.mxu0 %v1703_v4  ;;  %v1710_v11 = vld [vmem:[#allocation5 + $0xa8] sm:$0xff]   ;;  %v1711_v12 = vld [vmem:[#allocation5 + $0x60] sm:$0xff]   ;;  %v1715_v16 = vld [vmem:[#allocation5 + $0x58] sm:$0xff]   ;;  %p1888_p4 = scmp.ne.s32.totalorder %s2215_s12, %s1887_s30  ;;  %s1971_s28 = smov [#allocation10]  }
  0x6b   : > { %1482 = vmatprep.subr.bf16.mxu1 %v1704_v5  ;;  %v1712_v13 = vld [vmem:[#allocation5 + $0xe0] sm:$0xff]   ;;  %v1716_v17 = vld [vmem:[#allocation5 + $0xd8] sm:$0xff]   ;;  %v1719_v20 = vld [vmem:[#allocation5 + $0x50] sm:$0xff]   ;;  %s1891_s9 = sshll.u32 %s1971_s28, 4  ;;  %s1892_s9 = int_to_ptr.vmem [resolvable:$false] %s1891_s9 }
  0x6c   : > { %v1713_v14 = vld [vmem:[#allocation5 + $0x20] sm:$0xff]   ;;  %v1717_v18 = vld [vmem:[#allocation5 + $0x18] sm:$0xff]   ;;  %v1720_v21 = vld [vmem:[#allocation5 + $0xd0] sm:$0xff]   ;;  %p1889_p12 = pnand %p1888_p4, %p2290_p6  ;;  %s1893_s23 = scalar_lea.vmem %s1892_s9, 512 }
  0x6d   : > { %1461 = vmatpush3.bf16.msra.mxu0 %v1705_v6  ;;  %v1714_v15 = vld [vmem:[#allocation5 + $0xa0] sm:$0xff]   ;;  %v1718_v19 = vld [vmem:[#allocation5 + $0x98] sm:$0xff]   ;;  %v1721_v22 = vld [vmem:[#allocation5 + $0x10] sm:$0xff]   ;;  %p1894_p5 = scmp.lt.s32.totalorder %s2215_s12, %s1892_s9  ;;  %p1895_p3 = scmp.lt.s32.totalorder %s1893_s23, %s1887_s30 }
  0x6e   : > { %1483 = vmatpush3.bf16.msra.mxu1 %v1706_v7  ;;  %1462 = vmatprep.subr.bf16.mxu0 %v1707_v8  ;;  %v1722_v23 = vld [vmem:[#allocation5 + $0x90] sm:$0xff]   ;;  %v1723_v24 = vld [vmem:[#allocation5 + $0x48] sm:$0xff]   ;;  %v1727_v28 = vld [vmem:[#allocation5 + $0x40] sm:$0xff]   ;;  %p1890_p0 = pneg %p1889_p12 }
  0x6f   : > { %1484 = vmatprep.subr.bf16.mxu1 %v1708_v9  ;;  %v1724_v25 = vld [vmem:[#allocation5 + $0xc8] sm:$0xff]   ;;  %v1728_v29 = vld [vmem:[#allocation5 + $0xc0] sm:$0xff]   ;;  %v1736_v35 = vld [vmem:[%s2153_s21 + $0xc] ss:$28 sps:$4 sm:$0xff]   ;;  %p1896_p7 = por %p1895_p3, %p1894_p5 }
  0x70   : > { %v1725_v26 = vld [vmem:[#allocation5 + $0x8] sm:$0xff]   ;;  %v1729_v30 = vld [vmem:[#allocation5] sm:$0xff]   ;;  %v1737_v37 = vld [vmem:[#allocation5 + $0x178] sm:$0xff]   ;;  %917 = vmatprep.mubr.bf16.mxu1 %v1736_v35 }
  0x71   : > { %1463 = vmatpush3.bf16.msra.mxu0 %v1709_v10  ;;  %v1726_v27 = vld [vmem:[#allocation5 + $0x88] sm:$0xff]   ;;  %v1730_v31 = vld [vmem:[#allocation5 + $0x80] sm:$0xff]   ;;  %v1738_v38 = vld [vmem:[#allocation5 + $0x138] sm:$0xff]   ;;  %p1897_p9 = pnand %p1896_p7, %p1890_p0 }
  0x72   : > { %1485 = vmatpush3.bf16.msra.mxu1 %v1710_v11  ;;  %1464 = vmatprep.subr.bf16.mxu0 %v1711_v12  ;;  %v1731_v32 = vld [vmem:[%s2153_s21] ss:$28 sps:$4 sm:$0xff]   ;;  %v1734_v34 = vld [vmem:[%s2153_s21 + $0x8] ss:$28 sps:$4 sm:$0xff]   ;;  %v1763_v59 = vld [vmem:[%s2153_s21 + $0x14] ss:$28 sps:$4 sm:$0xff]  }
  0x73   : > { %1486 = vmatprep.subr.bf16.mxu1 %v1712_v13  ;;  %v1733_v33 = vld [vmem:[%s2153_s21 + $0x4] ss:$28 sps:$4 sm:$0xff]   ;;  %v1739_v39 = vld [vmem:[#allocation5 + $0x1b8] sm:$0xff]   ;;  %v1746_v46 = vld [vmem:[#allocation5 + $0x160] sm:$0xff]  }
  0x74   : > { %876 = vmatprep.mubr.bf16.mxu0 %v1733_v33  ;;  %v1740_v40 = vld [vmem:[#allocation5 + $0x170] sm:$0xff]   ;;  %v1743_v43 = vld [vmem:[#allocation5 + $0x168] sm:$0xff]   ;;  %v1747_v47 = vld [vmem:[#allocation5 + $0x120] sm:$0xff]  }
  0x75   : > { %1465 = vmatpush3.bf16.msra.mxu0 %v1713_v14  ;;  %v1741_v41 = vld [vmem:[#allocation5 + $0x130] sm:$0xff]   ;;  %v1744_v44 = vld [vmem:[#allocation5 + $0x128] sm:$0xff]   ;;  %v1748_v48 = vld [vmem:[#allocation5 + $0x1a0] sm:$0xff]  }
  0x76   : > { %1487 = vmatpush3.bf16.msra.mxu1 %v1714_v15  ;;  %1466 = vmatprep.subr.bf16.mxu0 %v1715_v16  ;;  %v1742_v42 = vld [vmem:[#allocation5 + $0x1b0] sm:$0xff]   ;;  %v1745_v45 = vld [vmem:[#allocation5 + $0x1a8] sm:$0xff]   ;;  %v1749_v49 = vld [vmem:[#allocation5 + $0x158] sm:$0xff]  }
  0x77   : > { %1488 = vmatprep.subr.bf16.mxu1 %v1716_v17  ;;  %v1750_v50 = vld [vmem:[#allocation5 + $0x118] sm:$0xff]   ;;  %v1752_v52 = vld [vmem:[#allocation5 + $0x150] sm:$0xff]   ;;  %v1755_v55 = vld [vmem:[#allocation5 + $0x148] sm:$0xff]  }
  0x78   : > { %v1751_v51 = vld [vmem:[#allocation5 + $0x198] sm:$0xff]   ;;  %v1753_v53 = vld [vmem:[#allocation5 + $0x110] sm:$0xff]   ;;  %v1756_v56 = vld [vmem:[#allocation5 + $0x108] sm:$0xff]  }
  0x79   : > { %1467 = vmatpush3.bf16.msra.mxu0 %v1717_v18  ;;  %v1754_v54 = vld [vmem:[#allocation5 + $0x190] sm:$0xff]   ;;  %v1757_v57 = vld [vmem:[#allocation5 + $0x188] sm:$0xff]   ;;  %v1758_v58 = vld [vmem:[#allocation5 + $0x140] sm:$0xff]  }
  0x7a   : > { %1489 = vmatpush3.bf16.msra.mxu1 %v1718_v19  ;;  %1468 = vmatprep.subr.bf16.mxu0 %v1719_v20  ;;  %v1759_v60 = vld [vmem:[#allocation5 + $0x100] sm:$0xff]   ;;  %v1765_v0 = vld [vmem:[#allocation7 + $0x38] sm:$0xff]   ;;  %v1766_v1 = vld [vmem:[#allocation7 + $0x30] sm:$0xff]  }
  0x7b   : > { %1490 = vmatprep.subr.bf16.mxu1 %v1720_v21  ;;  %v1760_v61 = vld [vmem:[#allocation5 + $0x180] sm:$0xff]   ;;  %v1767_v2 = vld [vmem:[#allocation7 + $0x28] sm:$0xff]   ;;  %v1769_v4 = vld [vmem:[#allocation7 + $0x18] sm:$0xff]  }
  0x7c   : > { %v1761_v62 = vld [vmem:[%s2153_s21 + $0x10] ss:$28 sps:$4 sm:$0xff]   ;;  %v1764_v63 = vld [vmem:[%s2153_s21 + $0x18] ss:$28 sps:$4 sm:$0xff]   ;;  %v1370_v20 = vld [vmem:[%s2265_s2] ss:$0 sm:$0xff] }
  0x7d   : > { %1469 = vmatpush3.bf16.msra.mxu0 %v1721_v22  ;;  %v1768_v3 = vld [vmem:[#allocation7 + $0x20] sm:$0xff]   ;;  %v1770_v5 = vld [vmem:[#allocation7 + $0x10] sm:$0xff]   ;;  %v1771_v6 = vld [vmem:[#allocation7 + $0x8] sm:$0xff]   ;;  %s1241_s21 = scalar_lea.sflag [#allocation4], %s2149_s22 }
  0x7e   : > { %1491 = vmatpush3.bf16.msra.mxu1 %v1722_v23  ;;  %1470 = vmatprep.subr.bf16.mxu0 %v1723_v24  ;;  %v1772_v7 = vld [vmem:[#allocation7] sm:$0xff]   ;;  %v1773_v8 = vld [vmem:[#allocation8 + $0x38] sm:$0xff]   ;;  %v1774_v9 = vld [vmem:[#allocation8 + $0x30] sm:$0xff]  }
  0x7f   : > { %1492 = vmatprep.subr.bf16.mxu1 %v1724_v25  ;;  %v1775_v10 = vld [vmem:[#allocation8 + $0x28] sm:$0xff]   ;;  %v1776_v11 = vld [vmem:[#allocation8 + $0x20] sm:$0xff]   ;;  %v1777_v12 = vld [vmem:[#allocation8 + $0x18] sm:$0xff]  }
  0x81   : > { %1471 = vmatpush3.bf16.msra.mxu0 %v1725_v26 }
  0x82   : > { %1493 = vmatpush3.bf16.msra.mxu1 %v1726_v27  ;;  %1472 = vmatprep.subr.bf16.mxu0 %v1727_v28 }
  0x83   : > { %1494 = vmatprep.subr.bf16.mxu1 %v1728_v29 }
  0x85   : > { %1473 = vmatpush3.bf16.msra.mxu0 %v1729_v30 }
  0x86   : > { %1495 = vmatpush3.bf16.msra.mxu1 %v1730_v31  ;;  %1502 = vmatprep.subr.bf16.mxu0 %v1737_v37 }
  0x87   : > { %1551 = vmatprep.subr.bf16.mxu1 %v1969_v36 }
  0x88   : > { %877 = vmatmul.mubr.bf16.vlgmr.msra.gmra.mxu0 %v1731_v32 }
  0x89   : > { %918 = vmatmul.mubr.bf16.vlgmr.msra.gmra.mxu1 %v1734_v34  ;;  %1503 = vmatpush3.bf16.msra.mxu0 %v1738_v38 }
  0x8a   : > { %1567 = vmatprep.mubr.msk.bf16.mxu1 %vm1970_vm0, %v1969_v36  ;;  %1552 = vmatpush3.bf16.msra.mxu1 %v1739_v39 }
  0x8b   : > { %1504 = vmatprep.subr.bf16.mxu0 %v1740_v40  ;;  %1553 = vmatprep.subr.bf16.mxu1 %v1969_v36 }
  0x8c   : > { %958 = vmatprep.mubr.bf16.mxu0 %v1763_v59 }
  0x8d   : > { %1505 = vmatpush3.bf16.msra.mxu0 %v1741_v41 }
  0x8e   : > { %1554 = vmatpush3.bf16.msra.mxu1 %v1742_v42  ;;  %1506 = vmatprep.subr.bf16.mxu0 %v1743_v43 }
  0x8f   : > { %1555 = vmatprep.subr.bf16.mxu1 %v1969_v36 }
  0x91   : > { %1507 = vmatpush3.bf16.msra.mxu0 %v1744_v44 }
  0x92   : > { %1556 = vmatpush3.bf16.msra.mxu1 %v1745_v45  ;;  %1508 = vmatprep.subr.bf16.mxu0 %v1746_v46 }
  0x93   : > { %1557 = vmatprep.subr.bf16.mxu1 %v1969_v36 }
  0x95   : > { %1509 = vmatpush3.bf16.msra.mxu0 %v1747_v47 }
  0x96   : > { %1558 = vmatpush3.bf16.msra.mxu1 %v1748_v48  ;;  %1510 = vmatprep.subr.bf16.mxu0 %v1749_v49  ;;  %v1778_v48 = vld [vmem:[#allocation8 + $0x10] sm:$0xff]   ;;  %v1779_v49 = vld [vmem:[#allocation8 + $0x8] sm:$0xff]  }
  0x97   : > { %1559 = vmatprep.subr.bf16.mxu1 %v1969_v36 }
  0x99   : > { %1511 = vmatpush3.bf16.msra.mxu0 %v1750_v50  ;;  %v1780_v50 = vld [vmem:[#allocation8] sm:$0xff]  }
  0x9a   : > { %1560 = vmatpush3.bf16.msra.mxu1 %v1751_v51  ;;  %1512 = vmatprep.subr.bf16.mxu0 %v1752_v52  ;;  %v1434_v51 = vld [vmem:[%s2267_s4] ss:$0 sm:$0xff] }
  0x9b   : > { %1561 = vmatprep.subr.bf16.mxu1 %v1969_v36 }
  0x9d   : > { %1513 = vmatpush3.bf16.msra.mxu0 %v1753_v53 }
  0x9e   : > { %1562 = vmatpush3.bf16.msra.mxu1 %v1754_v54  ;;  %1514 = vmatprep.subr.bf16.mxu0 %v1755_v55 }
  0x9f   : > { %1563 = vmatprep.subr.bf16.mxu1 %v1969_v36 }
  0xa1   : > { %1515 = vmatpush3.bf16.msra.mxu0 %v1756_v56 }
  0xa2   : > { %1564 = vmatpush3.bf16.msra.mxu1 %v1757_v57  ;;  %1516 = vmatprep.subr.bf16.mxu0 %v1758_v58 }
  0xa3   : > { %1565 = vmatprep.subr.bf16.mxu1 %v1969_v36 }
  0xa5   : > { %1517 = vmatpush3.bf16.msra.mxu0 %v1759_v60 }
  0xa6   : > { %1566 = vmatpush3.bf16.msra.mxu1 %v1760_v61  ;;  %1571 = vmatprep.subr.bf16.mxu0 %v1969_v36 }
  0xa7   : > { %1591 = vmatprep.subr.bf16.mxu1 %v1969_v36 }
  0xa8   : > { %959 = vmatmul.mubr.bf16.vlgmr.msra.gmra.mxu0 %v1761_v62 }
  0xa9   : > { %1568 = vmatmul.mubr.bf16.vlgmr.msra.gmra.mxu1 %v1764_v63  ;;  %1587 = vmatprep.mubr.msk.bf16.mxu0 %vm1970_vm0, %v1969_v36 }
  0xaa   : > { %1607 = vmatprep.mubr.msk.bf16.mxu1 %vm1970_vm0, %v1969_v36  ;;  %1572 = vmatpush3.bf16.msra.mxu0 %v1765_v0 }
  0xab   : > { %1573 = vmatprep.subr.bf16.mxu0 %v1969_v36  ;;  %1592 = vmatpush3.bf16.msra.mxu1 %v1773_v8 }
  0xac   : > { %1593 = vmatprep.subr.bf16.mxu1 %v1969_v36 }
  0xae   : > { %1574 = vmatpush3.bf16.msra.mxu0 %v1766_v1 }
  0xaf   : > { %1575 = vmatprep.subr.bf16.mxu0 %v1969_v36  ;;  %1594 = vmatpush3.bf16.msra.mxu1 %v1774_v9 }
  0xb0   : > { %1595 = vmatprep.subr.bf16.mxu1 %v1969_v36 }
  0xb2   : > { %1576 = vmatpush3.bf16.msra.mxu0 %v1767_v2 }
  0xb3   : > { %1577 = vmatprep.subr.bf16.mxu0 %v1969_v36  ;;  %1596 = vmatpush3.bf16.msra.mxu1 %v1775_v10 }
  0xb4   : > { %1597 = vmatprep.subr.bf16.mxu1 %v1969_v36 }
  0xb6   : > { %1578 = vmatpush3.bf16.msra.mxu0 %v1768_v3 }
  0xb7   : > { %1579 = vmatprep.subr.bf16.mxu0 %v1969_v36  ;;  %1598 = vmatpush3.bf16.msra.mxu1 %v1776_v11 }
  0xb8   : > { %1599 = vmatprep.subr.bf16.mxu1 %v1969_v36 }
  0xba   : > { %1580 = vmatpush3.bf16.msra.mxu0 %v1769_v4 }
  0xbb   : > { %1581 = vmatprep.subr.bf16.mxu0 %v1969_v36  ;;  %1600 = vmatpush3.bf16.msra.mxu1 %v1777_v12 }
  0xbc   : > { %1601 = vmatprep.subr.bf16.mxu1 %v1969_v36 }
  0xbe   : > { %1582 = vmatpush3.bf16.msra.mxu0 %v1770_v5 }
  0xbf   : > { %1583 = vmatprep.subr.bf16.mxu0 %v1969_v36  ;;  %1602 = vmatpush3.bf16.msra.mxu1 %v1778_v48 }
  0xc0   : > { %1603 = vmatprep.subr.bf16.mxu1 %v1969_v36 }
  0xc2   : > { %1584 = vmatpush3.bf16.msra.mxu0 %v1771_v6 }
  0xc3   : > { %1585 = vmatprep.subr.bf16.mxu0 %v1969_v36  ;;  %1604 = vmatpush3.bf16.msra.mxu1 %v1779_v49 }
  0xc4   : > { %1605 = vmatprep.subr.bf16.mxu1 %v1969_v36  ;;  %v1443_v36 = vld [vmem:[%s2269_s6] ss:$0 sm:$0xff] }
  0xc6   : > { %1586 = vmatpush3.bf16.msra.mxu0 %v1772_v7 }
  0xc7   : > { %1606 = vmatpush3.bf16.msra.mxu1 %v1780_v50 }
 0x148   : > { %v1474_v13 = vpop.f32.mrf.mxu0 }
 0x149   : > { %v1496_v14 = vpop.f32.mrf.mxu1 }
 0x14a   : > { %v1475_v15 = vpop.f32.mrf.mxu0 }
 0x14b   : > { %v1497_v16 = vpop.f32.mrf.mxu1  ;;  %v1476_v18 = vadd.f32 %v1475_v15, %v1474_v13 }
 0x14c   : > { %v1477_v17 = vpop.f32.mrf.mxu0  ;;  %v1498_v23 = vadd.f32 %v1497_v16, %v1496_v14 }
 0x14d   : > { %v1499_v19 = vpop.f32.mrf.mxu1  ;;  %v879_v22 = vadd.f32 %v1476_v18, %v1370_v20 }
 0x14e   : > { %v1478_v21 = vpop.f32.mrf.mxu0 }
 0x14f   : > { %v1479_v24 = vadd.f32 %v1478_v21, %v1477_v17  ;;  %v1500_v25 = vpop.f32.mrf.mxu1  ;;  %v920_v29 = vadd.f32 %v1498_v23, %v879_v22 }
 0x150   : > { %v1501_v31 = vadd.f32 %v1500_v25, %v1499_v19 }
 0x151   : > { %v882_v30 = vadd.f32 %v1479_v24, %v1370_v20 }
 0x153   : > { %v923_v39 = vadd.f32 %v1501_v31, %v882_v30 }
 0x168   : > { %v1518_v26 = vpop.f32.mrf.mxu0 }
 0x169   : > { %v1001_v27 = vpop.f32.mrf.mxu1 }
 0x16a   : > { %v1519_v28 = vpop.f32.mrf.mxu0 }
 0x16b   : > { %v1520_v32 = vadd.f32 %v1519_v28, %v1518_v26  ;;  %v1569_v33 = vpop.f32.mrf.mxu1 }
 0x16c   : > { %v1521_v34 = vpop.f32.mrf.mxu0 }
 0x16d   : > { %v961_v35 = vadd.f32 %v1520_v32, %v920_v29  ;;  %v1004_v37 = vpop.f32.mrf.mxu1 }
 0x16e   : > { %v1522_v38 = vpop.f32.mrf.mxu0 }
 0x16f   : > { %v1523_v40 = vadd.f32 %v1522_v38, %v1521_v34  ;;  %v1570_v41 = vpop.f32.mrf.mxu1  ;;  %v1002_v42 = vadd.f32 %v1001_v27, %v961_v35 }
 0x171   : > { %v964_v43 = vadd.f32 %v1523_v40, %v923_v39  ;;  %v1008_v45 = vmax.f32 %v1002_v42, 0.0 }
 0x173   : > { %v1005_v44 = vadd.f32 %v1004_v37, %v964_v43 }
 0x175   : > { %v1009_v46 = vmax.f32 %v1005_v44, 0.0 }
 0x177   : > { %v1010_v47 = vpack.c.bf16 %v1009_v46, %v1008_v45 }
 0x179   : > { %1588 = vmatmul.mubr.bf16.vlgmr.msra.gmra.mxu0 %v1010_v47 }
 0x239   : > { %v1116_v52 = vpop.f32.mrf.mxu0 }
 0x23a   : > { %v1117_v54 = vadd.f32 %v1434_v51, %v1116_v52 }
 0x23b   : > { %v1589_v53 = vpop.f32.mrf.mxu0 }
 0x23c   : > { %v1123_v58 = vmax.f32 %v1117_v54, 0.0 }
 0x23d   : > { %v1119_v55 = vpop.f32.mrf.mxu0 }
 0x23e   : > { %v1120_v56 = vadd.f32 %v1434_v51, %v1119_v55 }
 0x23f   : > { %v1590_v57 = vpop.f32.mrf.mxu0 }
 0x240   : > { %v1124_v59 = vmax.f32 %v1120_v56, 0.0 }
 0x242   : > { %v1125_v60 = vpack.c.bf16 %v1124_v59, %v1123_v58 }
 0x244   : > { %1608 = vmatmul.mubr.bf16.vlgmr.msra.gmra.mxu1 %v1125_v60 }
 0x304   : > { %v1231_v61 = vpop.f32.mrf.mxu1 }
 0x305   : > { %v1232_v62 = vadd.f32 %v1443_v36, %v1231_v61 }
 0x306   : > { %v1609_v63 = vpop.f32.mrf.mxu1 }
 0x307   : > { %1238 = vst [vmem:[%s341_s10] sm:$0xff] %v1232_v62 }
 0x308   : > { %v1234_v0 = vpop.f32.mrf.mxu1 }
 0x309   : > { %v1235_v1 = vadd.f32 %v1443_v36, %v1234_v0 }
 0x30a   : > { %v1610_v2 = vpop.f32.mrf.mxu1 }
 0x30b   : > { %1239 = vst [vmem:[%s341_s10 + $0x8] sm:$0xff] %v1235_v1 }
 0x30c   : > { %1900 = shalt.err (!%p1897_p9)
}
 0x30d   : > { %s1901_s29 = scalar_lea.hbm %s2220_s19, 256  ;;  %s1905_s16 = scalar_lea.hbm %s2270_s7, 512 }
 0x30e   : > { %p1902_p1 = scmp.ne.s32.totalorder %s2220_s19, %s1901_s29  ;;  %p1906_p11 = scmp.lt.s32.totalorder %s2220_s19, %s2270_s7 }
 0x30f   : > { %p1907_p13 = scmp.lt.s32.totalorder %s1905_s16, %s1901_s29 }
 0x310   : > { %p1903_p8 = pnand %p1902_p1, %p2290_p6 }
 0x311   : > { %p1908_p2 = por %p1907_p13, %p1906_p11 }
 0x312   : > { %p1904_p10 = pneg %p1903_p8 }
 0x314   : > { %p1909_p4 = pnand %p1908_p2, %p1904_p10 }
 0x316   : > { %1912 = shalt.err (!%p1909_p4)
}
 0x317   : > { %s1972_s15 = smov 128   ;;  %s1973_s18 = smov 8  }
 0x318   : > { %1628 = dma.vmem_to_hbm [thread:$0]  (%p2290_p6), %s2215_s12, 256, %s2220_s19, %s1241_s21, %s1972_s15, %s1972_s15, %s1973_s18  }
 0x319 PF: > { %s1269_s30 = sand.u32 1, %s1947_s24   ;;  %p2291_p12 = scmp.ne.s32.totalorder %s2277_s8, 0 }
 0x31a   : > { %p2292_p0 = scmp.ge.s32.totalorder %s1959_s27, 2  ;;  %s1270_s28 = scalar_lea.sflag [#allocation4], %s1269_s30 }
 0x31c   : > { %p1645_p5 = pnand %p2292_p0, %p2291_p12 }
 0x31e   : > { %p1646_p3 = pneg %p1645_p5 }
 0x320   : > { %1942 = dma.done.wait (%p1646_p3), %s1270_s28, 256  }
 0x321   : > { %1944 = vsyncadd (%p1646_p3), %s1270_s28, 4294967040  ;;  %p22_p7 = scmp.ge.s32.totalorder %s2094_s14, 4   ;;  %s2293_s24 = smov %s1951_s25 }
 0x322   : > { %s2294_s25 = smov %s1955_s26  ;;  %s2295_s26 = smov %s2104_s17 }
 0x323   : > { %s2296_s27 = smov %s2094_s14  ;;  %24 = sbr.rel (!%p22_p7) target bundleno = 9 (0x9), region = 105 }
 0x328   :  { %1275 = vsyncpa [#allocation3], 1 }
 0x329   :  { %1277 = vsyncpa [#allocation3 + $0x1], 1 }
 0x32a   :  { %1278 = vsyncpa [#allocation6], 1 }
 0x32b   :  { %1279 = vsyncpa [#allocation9], 1 }
 0x32c   :  { %1280 = vsyncpa [#allocation4], 1 }
 0x32d   :  { %1282 = vsyncpa [#allocation4 + $0x1], 1 }

</bundles_post_ra>
